<compile_context>
chip_gen: v5e
topology: v5e:2x2
jax: 0.10.0
libtpu: 0.0.40
codegen_flags: <defaults>
</compile_context>

<pallas_src>
import functools

import jax
import jax.numpy as jnp
import numpy as np
from jax import lax
from jax.experimental import pallas as pl
from jax.experimental.pallas import tpu as pltpu


# ----------------------------------------------------------------------------
# Generation-aware VMEM budget
# ----------------------------------------------------------------------------
def _vmem_config():
    """Returns (vmem_limit_bytes, is_multi_tensorcore_chip)."""
    try:
        kind = jax.devices()[0].device_kind.lower()
    except Exception:
        kind = ""
    if "v7" in kind or "7x" in kind:
        # v7x: 64 MiB VMEM per TensorCore, 2 TCs/chip -> conservative limit.
        return 40 * 1024 * 1024, True
    # v5e / v6e: 128 MiB physical VMEM; scoped default is conservative, raise it.
    return 64 * 1024 * 1024, False


# ----------------------------------------------------------------------------
# Fused kernel: out = LayerNorm_over_row(x + s), identity affine, one-pass stats
# ----------------------------------------------------------------------------
def _add_norm_kernel(x_ref, s_ref, o_ref, *, eps, inv_n):
    z = x_ref[...].astype(jnp.float32) + s_ref[...].astype(jnp.float32)  # VPU add
    s1 = jnp.sum(z, axis=-1, keepdims=True)                              # XLU reduce
    s2 = jnp.sum(z * z, axis=-1, keepdims=True)
    mean = s1 * inv_n
    var = s2 * inv_n - mean * mean                                       # biased var (torch LN)
    o_ref[...] = ((z - mean) * lax.rsqrt(var + eps)).astype(o_ref.dtype)  # rsqrt on EUP


# ----------------------------------------------------------------------------
# Two-stage fallback (rows too large for VMEM): stats pass + apply pass
# ----------------------------------------------------------------------------
def _stats_kernel(x_ref, s_ref, mean_ref, rstd_ref, sum_sc, sq_sc, *, eps, inv_n):
    k = pl.program_id(1)

    @pl.when(k == 0)
    def _():
        sum_sc[...] = jnp.zeros_like(sum_sc)
        sq_sc[...] = jnp.zeros_like(sq_sc)

    z = x_ref[...].astype(jnp.float32) + s_ref[...].astype(jnp.float32)
    sum_sc[...] += jnp.sum(z, axis=-1, keepdims=True)
    sq_sc[...] += jnp.sum(z * z, axis=-1, keepdims=True)

    @pl.when(k == pl.num_programs(1) - 1)
    def _():
        mean = sum_sc[...] * inv_n
        var = sq_sc[...] * inv_n - mean * mean
        mean_ref[...] = mean
        rstd_ref[...] = lax.rsqrt(var + eps)


def _apply_kernel(x_ref, s_ref, mean_ref, rstd_ref, o_ref):
    z = x_ref[...].astype(jnp.float32) + s_ref[...].astype(jnp.float32)
    o_ref[...] = ((z - mean_ref[...]) * rstd_ref[...]).astype(o_ref.dtype)


# ----------------------------------------------------------------------------
# Dispatcher
# ----------------------------------------------------------------------------
def add_norm_pallas(x2, s2, out_dtype, eps=1e-5, force_two_stage=False):
    """x2, s2: (B, N). LayerNorm over axis -1 of (x2 + s2), identity affine."""
    assert x2.shape == s2.shape and x2.ndim == 2
    B, N = x2.shape
    limit, multi_tc = _vmem_config()
    budget = (limit * 3) // 4                       # headroom for pipeline bookkeeping

    in_b = x2.dtype.itemsize + s2.dtype.itemsize
    out_b = np.dtype(out_dtype).itemsize
    # double-buffered inputs + double-buffered output + block-sized f32 temp (z)
    per_row = N * (2 * in_b + 2 * out_b + 4)
    tb_max = budget // per_row

    if not force_two_stage and tb_max >= min(B, 8):
        # ---------------- fused single-kernel path ----------------
        tb = min(B, tb_max)
        if tb < B:
            tb = max(8, (tb // 8) * 8)              # sublane-dense tiles
        if multi_tc and B >= 16:
            # keep >= 2 grid steps so ("parallel",) shards across both TCs
            tb = min(tb, max(8, ((B // 2) // 8) * 8))
        steps = pl.cdiv(B, tb)
        kernel = functools.partial(_add_norm_kernel, eps=eps, inv_n=1.0 / float(N))
        return pl.pallas_call(
            kernel,
            out_shape=jax.ShapeDtypeStruct((B, N), out_dtype),
            grid=(steps,),
            in_specs=[pl.BlockSpec((tb, N), lambda i: (i, 0)),
                      pl.BlockSpec((tb, N), lambda i: (i, 0))],
            out_specs=pl.BlockSpec((tb, N), lambda i: (i, 0)),
            compiler_params=pltpu.CompilerParams(
                dimension_semantics=("parallel",),  # megacore sharding on v7x
                vmem_limit_bytes=limit),
        )(x2, s2)

    # ---------------- two-stage path (tile the reduction axis) ----------------
    tb = min(B, 8)
    per_elem = 2 * in_b + 2 * out_b + 4
    tn = ((budget // (tb * per_elem)) // 128) * 128
    tn = max(128, min(tn, pl.cdiv(N, 128) * 128))
    n_steps = pl.cdiv(N, tn)
    n_pad = n_steps * tn
    if n_pad != N:
        # zero padding contributes nothing to sum / sum-of-squares (inv_n uses real N)
        x2p = jnp.pad(x2, ((0, 0), (0, n_pad - N)))
        s2p = jnp.pad(s2, ((0, 0), (0, n_pad - N)))
    else:
        x2p, s2p = x2, s2
    b_steps = pl.cdiv(B, tb)
    inv_n = 1.0 / float(N)

    stats = functools.partial(_stats_kernel, eps=eps, inv_n=inv_n)
    mean, rstd = pl.pallas_call(
        stats,
        out_shape=(jax.ShapeDtypeStruct((B, 1), jnp.float32),
                   jax.ShapeDtypeStruct((B, 1), jnp.float32)),
        grid=(b_steps, n_steps),
        in_specs=[pl.BlockSpec((tb, tn), lambda i, k: (i, k)),
                  pl.BlockSpec((tb, tn), lambda i, k: (i, k))],
        out_specs=(pl.BlockSpec((tb, 1), lambda i, k: (i, 0)),
                   pl.BlockSpec((tb, 1), lambda i, k: (i, 0))),
        scratch_shapes=[pltpu.VMEM((tb, 1), jnp.float32),
                        pltpu.VMEM((tb, 1), jnp.float32)],
        compiler_params=pltpu.CompilerParams(
            dimension_semantics=("parallel", "arbitrary"),
            vmem_limit_bytes=limit),
    )(x2p, s2p)

    out = pl.pallas_call(
        _apply_kernel,
        out_shape=jax.ShapeDtypeStruct((B, n_pad), out_dtype),
        grid=(b_steps, n_steps),
        in_specs=[pl.BlockSpec((tb, tn), lambda i, k: (i, k)),
                  pl.BlockSpec((tb, tn), lambda i, k: (i, k)),
                  pl.BlockSpec((tb, 1), lambda i, k: (i, 0)),
                  pl.BlockSpec((tb, 1), lambda i, k: (i, 0))],
        out_specs=pl.BlockSpec((tb, tn), lambda i, k: (i, k)),
        compiler_params=pltpu.CompilerParams(
            dimension_semantics=("parallel", "parallel"),
            vmem_limit_bytes=limit),
    )(x2p, s2p, mean, rstd)
    return out[:, :N] if n_pad != N else out


# ----------------------------------------------------------------------------
# Module-level wrapper mirroring Add_Norm.forward
# ----------------------------------------------------------------------------
def add_norm(x, sub_layer, **kwargs):
    sub_output = sub_layer(x, **kwargs)            # arbitrary sub-layer: plain JAX
    # dropout(p=0.1): identity in inference mode (see TODO at top of file)
    out_dtype = jnp.result_type(x.dtype, sub_output.dtype)
    B = x.shape[0]
    x2 = x.reshape(B, -1)                          # flatten sample dims; lane-dense last axis
    s2 = sub_output.reshape(B, -1)
    out = add_norm_pallas(x2, s2, out_dtype)
    return out.reshape(x.shape)


# ----------------------------------------------------------------------------
# Pure-JAX reference (mirrors the PyTorch code, eval-mode dropout)
# ----------------------------------------------------------------------------
def reference(x, sub_output, eps=1e-5):
    z = (x + sub_output).astype(jnp.float32)
    axes = tuple(range(1, z.ndim))                 # LayerNorm(x.size()[1:])
    mean = jnp.mean(z, axis=axes, keepdims=True)
    var = jnp.mean((z - mean) ** 2, axis=axes, keepdims=True)
    return (z - mean) / jnp.sqrt(var + eps)        # fresh LN => gamma=1, beta=0


if __name__ == "__main__":
    # Small shapes consistent with the transformer module: (batch, seq, hidden)
    B, S, D = 2, 8, 32

    key = jax.random.PRNGKey(0)
    kx, kw, kb = jax.random.split(key, 3)

    x = jax.random.normal(kx, (B, S, D), dtype=jnp.float32)
    W = 0.1 * jax.random.normal(kw, (D, D), dtype=jnp.float32)
    b = 0.1 * jax.random.normal(kb, (D,), dtype=jnp.float32)

    # Stand-in sub-layer (e.g. a feed-forward / attention block output).
    def sub_layer(t):
        return t @ W.T + b

    out = add_norm(x, sub_layer)
    out = jax.block_until_ready(out)

    ref = reference(x, sub_layer(x))
    assert out.shape == x.shape
    assert jnp.allclose(out, ref, atol=1e-4, rtol=1e-4), "fused path mismatch"

    # Also exercise the two-stage (row-exceeds-VMEM) fallback on the same data.
    x2 = x.reshape(B, -1)
    s2 = sub_layer(x).reshape(B, -1)
    out2 = add_norm_pallas(x2, s2, jnp.float32, force_two_stage=True)
    out2 = jax.block_until_ready(out2).reshape(x.shape)
    assert jnp.allclose(out2, ref, atol=1e-4, rtol=1e-4), "two-stage path mismatch"

    print("KERNEL_OK")
</pallas_src>

<mosaic_0001>
module attributes {stable_mosaic.version = 11 : i64} {
  func.func @_add_norm_kernel(%arg0: i32, %arg1: memref<2x256xf32, #tpu.memory_space<vmem>>, %arg2: memref<2x256xf32, #tpu.memory_space<vmem>>, %arg3: memref<2x256xf32, #tpu.memory_space<vmem>>) attributes {dimension_semantics = [#tpu.dimension_semantics<parallel>], iteration_bounds = array<i64: 1>, scalar_prefetch = 0 : i64, scratch_operands = 0 : i64, tpu.core_type = #tpu.core_type<tc>, window_params = [{transform_indices = @transform_0, window_bounds = array<i64: 2, 256>}, {transform_indices = @transform_1, window_bounds = array<i64: 2, 256>}, {transform_indices = @transform_2, window_bounds = array<i64: 2, 256>}]} {
    %c0 = arith.constant 0 : index
    %c0_0 = arith.constant 0 : index
    %0 = vector.load %arg1[%c0, %c0_0] : memref<2x256xf32, #tpu.memory_space<vmem>>, vector<2x256xf32>
    %c0_1 = arith.constant 0 : index
    %c0_2 = arith.constant 0 : index
    %1 = vector.load %arg2[%c0_1, %c0_2] : memref<2x256xf32, #tpu.memory_space<vmem>>, vector<2x256xf32>
    %2 = arith.addf %0, %1 : vector<2x256xf32>
    %cst = arith.constant dense<0.000000e+00> : vector<2xf32>
    %3 = vector.multi_reduction <add>, %2, %cst [1] : vector<2x256xf32> to vector<2xf32>
    %4 = vector.shape_cast %3 : vector<2xf32> to vector<2x1xf32>
    %5 = arith.mulf %2, %2 : vector<2x256xf32>
    %cst_3 = arith.constant dense<0.000000e+00> : vector<2xf32>
    %6 = vector.multi_reduction <add>, %5, %cst_3 [1] : vector<2x256xf32> to vector<2xf32>
    %7 = vector.shape_cast %6 : vector<2xf32> to vector<2x1xf32>
    %cst_4 = arith.constant 3.906250e-03 : f32
    %8 = vector.broadcast %cst_4 : f32 to vector<2x1xf32>
    %9 = arith.mulf %4, %8 : vector<2x1xf32>
    %cst_5 = arith.constant 3.906250e-03 : f32
    %10 = vector.broadcast %cst_5 : f32 to vector<2x1xf32>
    %11 = arith.mulf %7, %10 : vector<2x1xf32>
    %12 = arith.mulf %9, %9 : vector<2x1xf32>
    %13 = arith.subf %11, %12 : vector<2x1xf32>
    %14 = vector.broadcast %9 : vector<2x1xf32> to vector<2x256xf32>
    %15 = arith.subf %2, %14 : vector<2x256xf32>
    %cst_6 = arith.constant 9.99999974E-6 : f32
    %16 = vector.broadcast %cst_6 : f32 to vector<2x1xf32>
    %17 = arith.addf %13, %16 : vector<2x1xf32>
    %18 = math.rsqrt %17 : vector<2x1xf32>
    %19 = vector.broadcast %18 : vector<2x1xf32> to vector<2x256xf32>
    %20 = arith.mulf %15, %19 : vector<2x256xf32>
    %c0_7 = arith.constant 0 : index
    %c0_8 = arith.constant 0 : index
    %21 = vector.load %arg3[%c0_7, %c0_8] : memref<2x256xf32, #tpu.memory_space<vmem>>, vector<2x256xf32>
    tpu.vector_store %arg3[%c0_7, %c0_8], %20 {strides = array<i32>} : memref<2x256xf32, #tpu.memory_space<vmem>>, vector<2x256xf32>,
    return
  }
  func.func @transform_0(%arg0: i32) -> (i32, i32) {
    %c0_i32 = arith.constant 0 : i32
    %c0_i32_0 = arith.constant 0 : i32
    return %arg0, %c0_i32 : i32, i32
  }
  func.func @transform_1(%arg0: i32) -> (i32, i32) {
    %c0_i32 = arith.constant 0 : i32
    %c0_i32_0 = arith.constant 0 : i32
    return %arg0, %c0_i32 : i32, i32
  }
  func.func @transform_2(%arg0: i32) -> (i32, i32) {
    %c0_i32 = arith.constant 0 : i32
    %c0_i32_0 = arith.constant 0 : i32
    return %arg0, %c0_i32 : i32, i32
  }
}

</mosaic_0001>

<bundles_post_ra>
// kernel: tpu_custom_call.1
= control target key start
LH: loop header
LB: loop body
LE: loop exit
PB: predicated region body
PF: predicated region fallthrough
CT: control target
= control target key end

     0   :  { %7 = vsyncpa [#allocation3], 0  ;;  %s227_s0 = inlined_call_operand.hbm [shape: f32[2,256], index: 0, kind: input, shape index: {}]   ;;  %s228_s1 = inlined_call_operand.hbm [shape: f32[2,256], index: 1, kind: input, shape index: {}]   ;;  %s229_s2 = inlined_call_operand.hbm [shape: f32[2,256], index: 2, kind: output, shape index: {}]  }
   0x1   :  { %8 = vsyncpa [#allocation6], 0 }
   0x2   :  { %9 = vsyncpa [#allocation4], 0  ;;  %s15_s11 = sshll.u32 %s227_s0, 4  ;;  %s199_s12 = smov [#allocation2]   ;;  %s16_s11 = int_to_ptr.hbm [resolvable:$true] %s15_s11 }
   0x3   :  { %s17_s13 = sshll.u32 %s199_s12, 4  ;;  %s26_s16 = sshll.u32 %s228_s1, 4  ;;  %s18_s13 = int_to_ptr.vmem [resolvable:$true] %s17_s13  ;;  %s27_s16 = int_to_ptr.hbm [resolvable:$true] %s26_s16 }
   0x4   :  { %20 = dma.hbm_to_vmem [thread:$0]  %s16_s11, 64, %s18_s13, [#allocation3]  }
   0x5   :  { %s200_s17 = smov [#allocation5]  }
   0x6   :  { %s28_s18 = sshll.u32 %s200_s17, 4  ;;  %s29_s18 = int_to_ptr.vmem [resolvable:$true] %s28_s18 }
   0x7   :  { %31 = dma.hbm_to_vmem [thread:$0]  %s27_s16, 64, %s29_s18, [#allocation6]  }
   0x8   :  { %193 = dma.done.wait [#allocation3], 64  }
   0x9   :  { %194 = vsyncadd [#allocation3], 4294967232 }
   0xa   :  { %195 = dma.done.wait [#allocation6], 64  }
   0xb   :  { %196 = vsyncadd [#allocation6], 4294967232  ;;  %v40_v0 = vld [vmem:[#allocation2] sm:$0xf]  ;;  %v41_v1 = vld [vmem:[#allocation5] sm:$0xf] }
   0xc   :  { %v42_v2 = vadd.f32 %v41_v1, %v40_v0  ;;  %vm49_vm0 = vcmask 1041408   ;;  %v201_v22 = vmov 269488144   ;;  %s202_s0 = smov [#allocation7]   ;;  %s104_s21 = sshll.u32 %s229_s2, 4  ;;  %s105_s21 = int_to_ptr.hbm [resolvable:$true] %s104_s21 }
   0xd   :  { %v73_v23 = vunpack.c.l.s4 %v201_v22  ;;  %s102_s1 = sshll.u32 %s202_s0, 4  ;;  %s103_s1 = int_to_ptr.vmem [resolvable:$true] %s102_s1 }
   0xe   :  { %44 = vst [vmem:[#allocation1] ss:$4 sm:$0xff] %v42_v2  ;;  %v55_v3 = vmul.f32 %v42_v2, %v42_v2 }
   0xf   :  { %v74_v26 = vunpack.c.0.s8 %v73_v23 }
  0x15   :  { %v45_v4 = vld.sshfl [vmem:[#allocation1] sm:$0xff pattern:$0x73625140]  ;;  %v46_v5 = vld.sshfl [vmem:[#allocation1 + $0x8] sm:$0xff pattern:$0x73625140] }
  0x16   :  { %v50_v6 = vsel %vm49_vm0, %v45_v4, 0.0  ;;  %v51_v7 = vsel %vm49_vm0, %v46_v5, 0.0  ;;  %57 = vst [vmem:[#allocation1] ss:$4 sm:$0xff] %v55_v3 }
  0x17   :  { %v52_v8 = vadd.f32 %v51_v7, %v50_v6 }
  0x19   :  { %53 = vadd.xlane.f32.xlu0 %v52_v8 }
  0x1d   :  { %v58_v9 = vld.sshfl [vmem:[#allocation1] sm:$0xff pattern:$0x73625140]  ;;  %v59_v10 = vld.sshfl [vmem:[#allocation1 + $0x8] sm:$0xff pattern:$0x73625140] }
  0x1e   :  { %v62_v11 = vsel %vm49_vm0, %v58_v9, 0.0  ;;  %v63_v12 = vsel %vm49_vm0, %v59_v10, 0.0 }
  0x1f   :  { %v64_v13 = vadd.f32 %v63_v12, %v62_v11 }
  0x21   :  { %65 = vadd.xlane.f32.xlu0 %v64_v13 }
  0x8c   :  { %v54_v14 = vpop.xlane.xlu0 %53 }
  0x8d   :  { %v67_v15 = vmul.f32 0.00390625, %v54_v14 }
  0x8f   :  { %v69_v17 = vmul.f32 %v67_v15, %v67_v15  ;;  %v75_v29 = vperm.slane %v67_v15, %v74_v26 }
  0x91   :  { %v77_v32 = vsub.f32 %v42_v2, %v75_v29 }
  0x94   :  { %v66_v16 = vpop.xlane.xlu0 %65 }
  0x95   :  { %v68_v18 = vmul.f32 0.00390625, %v66_v16 }
  0x97   :  { %v70_v19 = vsub.f32 %v68_v18, %v69_v17 }
  0x99   :  { %v78_v20 = vadd.f32 1e-05, %v70_v19 }
  0x9b   :  { %119 = vrsqrt.f32 %v78_v20  ;;  %vm85_vm2 = vweird.f32 %v78_v20 }
  0xa1   :  { %v120_v21 = vpop.eup %119 }
  0xa2   :  { %v80_v24 = vmul.f32 %v120_v21, %v78_v20  ;;  %vm86_vm1 = vweird.f32 %v120_v21 }
  0xa3   :  { %vm87_vm3 = vmor %vm85_vm2, %vm86_vm1 }
  0xa4   :  { %v81_v25 = vmul.f32 %v120_v21, %v80_v24 }
  0xa6   :  { %v82_v27 = vmul.f32 0.5, %v81_v25 }
  0xa8   :  { %v83_v28 = vsub.f32 1.5, %v82_v27 }
  0xaa   :  { %v84_v30 = vmul.f32 %v120_v21, %v83_v28 }
  0xac   :  { %v88_v31 = vsel %vm87_vm3, %v120_v21, %v84_v30 }
  0xad   :  { %v93_v33 = vperm.slane %v88_v31, %v74_v26 }
  0xaf   :  { %v95_v34 = vmul.f32 %v93_v33, %v77_v32 }
  0xb1   :  { %96 = vst [vmem:[#allocation7] sm:$0xf] %v95_v34 }
  0xb2   :  { %107 = dma.vmem_to_hbm [thread:$0]  %s103_s1, 64, %s105_s21, [#allocation4]  }
  0xb3   :  { %197 = dma.done.wait [#allocation4], 64  }
  0xb4   :  { %198 = vsyncadd [#allocation4], 4294967232 }
  0xb5   :  { %112 = vsyncpa [#allocation3], 1 }
  0xb6   :  { %113 = vsyncpa [#allocation6], 1 }
  0xb7   :  { %114 = vsyncpa [#allocation4], 1 }

</bundles_post_ra>
